<compile_context>
chip_gen: v7x
topology: tpu7x:2x2x1
jax: 0.10.0
libtpu: 0.0.40
codegen_flags: <defaults>
</compile_context>

<pallas_src>
from functools import partial

import jax
import jax.numpy as jnp
from jax import lax
from jax.experimental import pallas as pl
from jax.experimental.pallas import tpu as pltpu

EPS = 1e-5  # nn.BatchNorm2d default eps


# ----------------------------------------------------------------------------
# BN folding helpers (trace-time glue on tiny weight tensors).
# ----------------------------------------------------------------------------
def fuse_bn(p):
    scale = p["gamma"] / jnp.sqrt(p["var"] + EPS)
    bias = p["beta"] - p["mean"] * scale
    return scale, bias


def fold_conv1x1(p, dtype=jnp.bfloat16):
    # OIHW (k=1) -> (Cin, Cout) with the BN scale folded in; bias kept f32.
    scale, bias = fuse_bn(p)
    w_io = jnp.transpose(p["w"][:, :, 0, 0], (1, 0)) * scale[None, :]
    return w_io.astype(dtype), bias.reshape(1, -1).astype(jnp.float32)


def fold_conv3x3_grouped(p, dtype=jnp.bfloat16):
    # OIHW -> (kh, kw, Cin, Cout) -> grouped per kernel row: (3, 3*Cin, Cout).
    # The 3*Cin axis is ordered [kw=0 | kw=1 | kw=2], matching the
    # [dw=-1 | dw=0 | dw=+1] slab layout built inside the bottleneck kernel.
    cout, cin = p["w"].shape[0], p["w"].shape[1]
    scale, bias = fuse_bn(p)
    w = jnp.transpose(p["w"], (2, 3, 1, 0)) * scale[None, None, None, :]
    return (w.reshape(3, 3 * cin, cout).astype(dtype),
            bias.reshape(1, -1).astype(jnp.float32))


# ----------------------------------------------------------------------------
# Kernel 1: generic pointwise conv  out = SiLU(x @ W + bias)
#   Used for (a) fused cv1+cv2 (W = [W1 | W2], one lane-dense output) and
#   (b) the degenerate n == 0 path (cv3 on the concat, which is just one matmul).
# ----------------------------------------------------------------------------
def _pw_kernel(x_ref, w_ref, b_ref, o_ref):
    a = jnp.dot(x_ref[...], w_ref[...], preferred_element_type=jnp.float32) + b_ref[...]
    o_ref[...] = (a * jax.nn.sigmoid(a)).astype(o_ref.dtype)


def _pick_tm(M):
    # Large row tiles amortize ~0.35us/step grid overhead; keep >= 4 blocks so
    # both TensorCores get >= 2 steps each.
    for tm in (2048, 1024, 512, 256, 128, 64, 32, 16, 8):
        if tm <= M and -(-M // tm) >= 4:
            return tm
    return min(M, 512)


def pw_conv(x2d, w, b, out_dtype):
    M, cin = x2d.shape
    cout = w.shape[1]
    TM = _pick_tm(M)
    grid_m = -(-M // TM)
    est = 2 * TM * cin * x2d.dtype.itemsize + 2 * TM * cout * 4 + cin * cout * 2
    vmem = int(min(max(3 * est, 8 << 20), 40 << 20))
    return pl.pallas_call(
        _pw_kernel,
        out_shape=jax.ShapeDtypeStruct((M, cout), out_dtype),
        grid_spec=pltpu.PrefetchScalarGridSpec(
            num_scalar_prefetch=0,
            grid=(grid_m,),
            in_specs=[
                pl.BlockSpec((TM, cin), lambda i: (i, 0)),
                pl.BlockSpec((cin, cout), lambda i: (0, 0)),
                pl.BlockSpec((1, cout), lambda i: (0, 0)),
            ],
            out_specs=pl.BlockSpec((TM, cout), lambda i: (i, 0)),
        ),
        compiler_params=pltpu.CompilerParams(
            dimension_semantics=("parallel",), vmem_limit_bytes=vmem),
    )(x2d, w, b)


# ----------------------------------------------------------------------------
# Kernel 2: fused Bottleneck (1x1 -> 3x3 -> residual), row-tiled over H with a
# 1-row manual-DMA halo.  Optionally the C3 cv3 (1x1 on the channel concat) is
# fused into the same kernel so `b` never hits HBM and the concat never exists.
# ----------------------------------------------------------------------------
def _bneck_kernel(*refs, W, TH, c_, fuse_cv3, separate_y2):
    if fuse_cv3 and separate_y2:
        (b_blk, y2_blk, b_any, w1_ref, b1_ref, w2_ref, b2_ref,
         w3a_ref, w3b_ref, b3_ref, o_ref, q_ref, halo_ref, sem) = refs
    elif fuse_cv3:
        (b_blk, b_any, w1_ref, b1_ref, w2_ref, b2_ref,
         w3a_ref, w3b_ref, b3_ref, o_ref, q_ref, halo_ref, sem) = refs
        y2_blk = b_blk
    else:
        (b_blk, b_any, w1_ref, b1_ref, w2_ref, b2_ref,
         o_ref, q_ref, halo_ref, sem) = refs
        y2_blk = None

    n = pl.program_id(0)
    h = pl.program_id(1)
    n_h = pl.num_programs(1)
    THW = TH * W
    M_h = (TH + 2) * W

    # --- 1-row halos of the bottleneck input (manual DMA; tiny, overlapped) ----
    @pl.when(h > 0)
    def _():
        pltpu.make_async_copy(b_any.at[n, pl.ds((h * TH - 1) * W, W), :],
                              halo_ref.at[0], sem.at[0]).start()

    @pl.when(h < n_h - 1)
    def _():
        pltpu.make_async_copy(b_any.at[n, pl.ds((h + 1) * TH * W, W), :],
                              halo_ref.at[1], sem.at[1]).start()

    @pl.when(h > 0)
    def _():
        pltpu.make_async_copy(b_any.at[n, pl.ds((h * TH - 1) * W, W), :],
                              halo_ref.at[0], sem.at[0]).wait()

    @pl.when(h < n_h - 1)
    def _():
        pltpu.make_async_copy(b_any.at[n, pl.ds((h + 1) * TH * W, W), :],
                              halo_ref.at[1], sem.at[1]).wait()

    x_mid = b_blk[0][:, 0:c_]                      # (THW, c_) bf16
    x_top = halo_ref[0][:, 0:c_]                   # (W, c_)   (stale at edges, killed below)
    x_bot = halo_ref[1][:, 0:c_]
    x_halo = jnp.concatenate([x_top, x_mid, x_bot], axis=0)   # (M_h, c_)

    # inner = SiLU(BN(1x1 conv(x)))  (BN scale folded into w1; f32 accumulate)
    a = jnp.dot(x_halo, w1_ref[...], preferred_element_type=jnp.float32) + b1_ref[...]
    inner = a * jax.nn.sigmoid(a)

    # Zero the halo rows that fall outside the image ('same' padding of the 3x3).
    row = lax.broadcasted_iota(jnp.int32, (M_h, 1), 0)
    kill = jnp.logical_or(jnp.logical_and(h == 0, row < W),
                          jnp.logical_and(h == n_h - 1, row >= W + THW))
    inner = jnp.where(kill, 0.0, inner).astype(jnp.bfloat16)

    # Build the (M_h, 3*c_) [dw=-1 | dw=0 | dw=+1] slab; rolls go to the XLU and
    # the row-wrap positions (w == 0 / w == W-1) are masked with in-register iota.
    w_pos = row % W
    s_l = jnp.where(w_pos == 0, 0.0,
                    pltpu.roll(inner, shift=1, axis=0)).astype(jnp.bfloat16)
    s_r = jnp.where(w_pos == W - 1, 0.0,
                    pltpu.roll(inner, shift=M_h - 1, axis=0)).astype(jnp.bfloat16)
    q_ref[...] = jnp.concatenate([s_l, inner, s_r], axis=1)

    # 3x3 conv as 3 fat matmuls (K = 3*c_), one per kernel row dh; row offsets are
    # dh*W, i.e. sublane-aligned whenever W % 8 == 0.
    acc = jnp.zeros((THW, c_), jnp.float32)
    for t in range(3):                             # dh = t - 1
        acc = acc + jnp.dot(q_ref[t * W:t * W + THW, :], w2_ref[t],
                            preferred_element_type=jnp.float32)
    y = acc + b2_ref[...]
    y = y * jax.nn.sigmoid(y)
    b_new = x_mid.astype(jnp.float32) + y          # residual (c_in == c_out)

    if not fuse_cv3:
        o_ref[0] = b_new.astype(o_ref.dtype)
    else:
        # cv3 fused: out = SiLU(b_new @ W3[:c_] + y2 @ W3[c_:] + bias3)
        y2 = y2_blk[0][:, c_:2 * c_]
        a3 = (jnp.dot(b_new.astype(jnp.bfloat16), w3a_ref[...],
                      preferred_element_type=jnp.float32)
              + jnp.dot(y2, w3b_ref[...], preferred_element_type=jnp.float32)
              + b3_ref[...])
        o_ref[0] = (a3 * jax.nn.sigmoid(a3)).astype(o_ref.dtype)


def _bneck_est(th, W, w_in, c_, c_out):
    thw, m_h = th * W, (th + 2) * W
    return (2 * thw * w_in * 2            # blocked input, double-buffered (bf16)
            + 2 * thw * max(c_out, c_) * 4  # output blocks (worst case f32)
            + m_h * 3 * c_ * 2            # stacked slab scratch (bf16)
            + 4 * m_h * c_ * 4            # live f32/bf16 working slabs
            + 2 * thw * c_out * 4)        # cv3 accumulators


def _pick_th(N, H, W, w_in, c_, c_out, budget=12 << 20):
    divs = [d for d in range(H, 0, -1)
            if H % d == 0 and (d == H or (d * W) % 8 == 0)]
    fitting = [d for d in divs if _bneck_est(d, W, w_in, c_, c_out) <= budget] or [divs[-1]]
    for d in fitting:                       # descending order
        if N * (H // d) >= 2:               # keep both TensorCores busy
            return d, _bneck_est(d, W, w_in, c_, c_out)
    d = fitting[0]
    return d, _bneck_est(d, W, w_in, c_, c_out)


def run_bottleneck(b_in, blk_p, H, W, c_, *, cv3_p=None, y12=None,
                   out_dtype=jnp.bfloat16):
    N, HW, w_in = b_in.shape
    assert HW == H * W
    fuse_cv3 = cv3_p is not None
    separate_y2 = fuse_cv3 and (y12 is not None)

    w1, b1 = fold_conv1x1(blk_p["cv1"])
    w2, b2 = fold_conv3x3_grouped(blk_p["cv2"])
    c_out = c_
    if fuse_cv3:
        w3, b3 = fold_conv1x1(cv3_p)
        c_out = w3.shape[1]
        w3a, w3b = w3[:c_, :], w3[c_:, :]

    TH, est = _pick_th(N, H, W, w_in, c_, c_out)
    nH = H // TH
    THW = TH * W
    M_h = (TH + 2) * W
    vmem = int(min(max(2 * est + (4 << 20), 16 << 20), 40 << 20))

    kernel = partial(_bneck_kernel, W=W, TH=TH, c_=c_,
                     fuse_cv3=fuse_cv3, separate_y2=separate_y2)

    in_arrays = [b_in]
    in_specs = [pl.BlockSpec((1, THW, w_in), lambda n, h: (n, h, 0))]
    if separate_y2:
        in_arrays.append(y12)
        in_specs.append(pl.BlockSpec((1, THW, y12.shape[-1]), lambda n, h: (n, h, 0)))
    in_arrays.append(b_in)                                # raw HBM alias for halo DMAs
    in_specs.append(pl.BlockSpec(memory_space=pl.ANY))
    in_arrays += [w1, b1, w2, b2]
    in_specs += [
        pl.BlockSpec((c_, c_), lambda n, h: (0, 0)),
        pl.BlockSpec((1, c_), lambda n, h: (0, 0)),
        pl.BlockSpec((3, 3 * c_, c_), lambda n, h: (0, 0, 0)),
        pl.BlockSpec((1, c_), lambda n, h: (0, 0)),
    ]
    if fuse_cv3:
        in_arrays += [w3a, w3b, b3]
        in_specs += [
            pl.BlockSpec((c_, c_out), lambda n, h: (0, 0)),
            pl.BlockSpec((c_, c_out), lambda n, h: (0, 0)),
            pl.BlockSpec((1, c_out), lambda n, h: (0, 0)),
        ]

    return pl.pallas_call(
        kernel,
        out_shape=jax.ShapeDtypeStruct((N, HW, c_out), out_dtype),
        grid_spec=pltpu.PrefetchScalarGridSpec(
            num_scalar_prefetch=0,
            grid=(N, nH),
            in_specs=in_specs,
            out_specs=pl.BlockSpec((1, THW, c_out), lambda n, h: (n, h, 0)),
            scratch_shapes=[
                pltpu.VMEM((M_h, 3 * c_), jnp.bfloat16),   # [dw=-1|0|+1] slab
                pltpu.VMEM((2, W, w_in), jnp.bfloat16),    # top/bottom halo rows
                pltpu.SemaphoreType.DMA((2,)),
            ]),
        compiler_params=pltpu.CompilerParams(
            dimension_semantics=("parallel", "parallel"), vmem_limit_bytes=vmem),
    )(*in_arrays)


# ----------------------------------------------------------------------------
# Parameter setup (random weights mimicking the PyTorch module in eval mode)
# ----------------------------------------------------------------------------
def init_conv(key, cin, cout, k):
    k1, k2, k3, k4, k5 = jax.random.split(key, 5)
    w = jax.random.normal(k1, (cout, cin, k, k), jnp.float32) / ((cin * k * k) ** 0.5)
    gamma = 1.0 + 0.1 * jax.random.normal(k2, (cout,), jnp.float32)
    beta = 0.1 * jax.random.normal(k3, (cout,), jnp.float32)
    mean = 0.1 * jax.random.normal(k4, (cout,), jnp.float32)
    var = 1.0 + 0.5 * jax.random.uniform(k5, (cout,), jnp.float32)
    return dict(w=w, gamma=gamma, beta=beta, mean=mean, var=var)


def init_c3_params(key, c1, c2, n=1, e=0.5):
    c_ = int(c2 * e)
    keys = jax.random.split(key, 3 + 2 * n)
    return {
        "cv1": init_conv(keys[0], c1, c_, 1),
        "cv2": init_conv(keys[1], c1, c_, 1),
        "cv3": init_conv(keys[2], 2 * c_, c2, 1),
        "m": [
            {"cv1": init_conv(keys[3 + 2 * i], c_, c_, 1),
             "cv2": init_conv(keys[4 + 2 * i], c_, c_, 3)}
            for i in range(n)
        ],
    }


# ----------------------------------------------------------------------------
# C3 forward (Pallas path)
# ----------------------------------------------------------------------------
def c3_pallas(x_nchw, P):
    N, c1, H, W = x_nchw.shape
    HW = H * W
    c_ = P["cv1"]["w"].shape[0]
    c2 = P["cv3"]["w"].shape[0]

    # NCHW -> flattened NHWC bf16 at the boundary (halves HBM traffic of the 1x1s).
    x2d = jnp.transpose(x_nchw, (0, 2, 3, 1)).reshape(N * HW, c1).astype(jnp.bfloat16)

    # Fused cv1 + cv2: one HBM read of x, one lane-dense (M, 2*c_) output [y1 | y2].
    w1a, b1a = fold_conv1x1(P["cv1"])
    w1b, b1b = fold_conv1x1(P["cv2"])
    w12 = jnp.concatenate([w1a, w1b], axis=1)
    b12 = jnp.concatenate([b1a, b1b], axis=1)
    y12 = pw_conv(x2d, w12, b12, jnp.bfloat16).reshape(N, HW, 2 * c_)

    blocks = P["m"]
    if not blocks:
        # n == 0: C3 degenerates to cv3(cat(cv1(x), cv2(x))), i.e. one 1x1 conv.
        w3, b3 = fold_conv1x1(P["cv3"])
        out = pw_conv(y12.reshape(N * HW, 2 * c_), w3, b3, x_nchw.dtype)
        return jnp.transpose(out.reshape(N, H, W, c2), (0, 3, 1, 2))

    # Bottleneck chain; y1 lives in columns [0:c_] of the previous kernel's output
    # (the first block reads y12 directly), the last block also applies cv3.
    b = y12
    for blk in blocks[:-1]:
        b = run_bottleneck(b, blk, H, W, c_)
    out = run_bottleneck(b, blocks[-1], H, W, c_, cv3_p=P["cv3"],
                         y12=None if len(blocks) == 1 else y12,
                         out_dtype=x_nchw.dtype)
    return jnp.transpose(out.reshape(N, H, W, c2), (0, 3, 1, 2))


# ----------------------------------------------------------------------------
# Pure-JAX reference (NCHW, f32, mirrors the PyTorch module in eval mode)
# ----------------------------------------------------------------------------
def conv_bn_silu_ref(x, p, k):
    pad = k // 2
    y = lax.conv_general_dilated(
        x, p["w"], window_strides=(1, 1),
        padding=[(pad, pad), (pad, pad)],
        dimension_numbers=("NCHW", "OIHW", "NCHW"))
    scale, bias = fuse_bn(p)
    y = y * scale[None, :, None, None] + bias[None, :, None, None]
    return y * jax.nn.sigmoid(y)


def c3_ref(x, P):
    y1 = conv_bn_silu_ref(x, P["cv1"], 1)
    y2 = conv_bn_silu_ref(x, P["cv2"], 1)
    b = y1
    for blk in P["m"]:
        inner = conv_bn_silu_ref(b, blk["cv1"], 1)
        b = b + conv_bn_silu_ref(inner, blk["cv2"], 3)
    cat = jnp.concatenate([b, y2], axis=1)
    return conv_bn_silu_ref(cat, P["cv3"], 1)


if __name__ == "__main__":
    key = jax.random.PRNGKey(0)
    c1, c2, n = 8, 8, 1
    pkey, xkey = jax.random.split(key)
    P = init_c3_params(pkey, c1, c2, n=n, e=0.5)
    x = jax.random.normal(xkey, (2, c1, 16, 16), jnp.float32)

    out = jax.block_until_ready(c3_pallas(x, P))
    ref = jax.block_until_ready(c3_ref(x, P))

    assert out.shape == ref.shape == (2, c2, 16, 16)
    max_err = float(jnp.max(jnp.abs(out - ref)))
    # bf16 MXU inputs (f32 accumulation) vs f32 reference -> loosened tolerance.
    if max_err < 1e-1:
        print("KERNEL_OK")
    else:
        print(f"MISMATCH max_abs_err={max_err}")
</pallas_src>

<mosaic_0001>
module attributes {stable_mosaic.version = 11 : i64} {
  func.func @_pw_kernel(%arg0: i32, %arg1: memref<128x8xbf16, #tpu.memory_space<vmem>>, %arg2: memref<8x8xbf16, #tpu.memory_space<vmem>>, %arg3: memref<1x8xf32, #tpu.memory_space<vmem>>, %arg4: memref<128x8xbf16, #tpu.memory_space<vmem>>) attributes {dimension_semantics = [#tpu.dimension_semantics<parallel>], iteration_bounds = array<i64: 4>, scalar_prefetch = 0 : i64, scratch_operands = 0 : i64, tpu.core_type = #tpu.core_type<tc>, window_params = [{transform_indices = @transform_0, window_bounds = array<i64: 128, 8>}, {pipeline_mode = #tpu.pipeline_mode<synchronous>, transform_indices = @transform_1, window_bounds = array<i64: 8, 8>}, {pipeline_mode = #tpu.pipeline_mode<synchronous>, transform_indices = @transform_2, window_bounds = array<i64: 1, 8>}, {transform_indices = @transform_3, window_bounds = array<i64: 128, 8>}]} {
    %c0 = arith.constant 0 : index
    %c0_0 = arith.constant 0 : index
    %0 = vector.load %arg1[%c0, %c0_0] : memref<128x8xbf16, #tpu.memory_space<vmem>>, vector<128x8xbf16>
    %c0_1 = arith.constant 0 : index
    %c0_2 = arith.constant 0 : index
    %1 = vector.load %arg2[%c0_1, %c0_2] : memref<8x8xbf16, #tpu.memory_space<vmem>>, vector<8x8xbf16>
    %cst = arith.constant dense<0.000000e+00> : vector<128x8xf32>
    %2 = tpu.matmul %0, %1, %cst {dimension_numbers = #tpu.dot_dimension_numbers<[1], [0], [0], [1], [0, 0, 1, 1], [], []>} : vector<128x8xbf16>, vector<8x8xbf16>, vector<128x8xf32> -> vector<128x8xf32>
    %c0_3 = arith.constant 0 : index
    %c0_4 = arith.constant 0 : index
    %3 = vector.load %arg3[%c0_3, %c0_4] : memref<1x8xf32, #tpu.memory_space<vmem>>, vector<1x8xf32>
    %4 = vector.broadcast %3 : vector<1x8xf32> to vector<128x8xf32>
    %5 = arith.addf %2, %4 : vector<128x8xf32>
    %6 = arith.negf %5 : vector<128x8xf32>
    %7 = math.exp %6 : vector<128x8xf32>
    %cst_5 = arith.constant 1.000000e+00 : f32
    %8 = vector.broadcast %cst_5 : f32 to vector<128x8xf32>
    %9 = arith.addf %8, %7 : vector<128x8xf32>
    %10 = arith.divf %8, %9 : vector<128x8xf32>
    %11 = arith.mulf %5, %10 : vector<128x8xf32>
    %12 = arith.truncf %11 : vector<128x8xf32> to vector<128x8xbf16>
    %c0_6 = arith.constant 0 : index
    %c0_7 = arith.constant 0 : index
    %13 = vector.load %arg4[%c0_6, %c0_7] : memref<128x8xbf16, #tpu.memory_space<vmem>>, vector<128x8xbf16>
    tpu.vector_store %arg4[%c0_6, %c0_7], %12 {strides = array<i32>} : memref<128x8xbf16, #tpu.memory_space<vmem>>, vector<128x8xbf16>,
    return
  }
  func.func @transform_0(%arg0: i32) -> (i32, i32) {
    %c0_i32 = arith.constant 0 : i32
    %c0_i32_0 = arith.constant 0 : i32
    return %arg0, %c0_i32 : i32, i32
  }
  func.func @transform_1(%arg0: i32) -> (i32, i32) {
    %c0_i32 = arith.constant 0 : i32
    %c0_i32_0 = arith.constant 0 : i32
    %c0_i32_1 = arith.constant 0 : i32
    return %c0_i32, %c0_i32_0 : i32, i32
  }
  func.func @transform_2(%arg0: i32) -> (i32, i32) {
    %c0_i32 = arith.constant 0 : i32
    %c0_i32_0 = arith.constant 0 : i32
    %c0_i32_1 = arith.constant 0 : i32
    return %c0_i32, %c0_i32_0 : i32, i32
  }
  func.func @transform_3(%arg0: i32) -> (i32, i32) {
    %c0_i32 = arith.constant 0 : i32
    %c0_i32_0 = arith.constant 0 : i32
    return %arg0, %c0_i32 : i32, i32
  }
}

</mosaic_0001>

<bundles_post_ra>
// kernel: tpu_custom_call.1
= control target key start
LH: loop header
LB: loop body
LE: loop exit
PB: predicated region body
PF: predicated region fallthrough
CT: control target
= control target key end

     0   :  { %s829_s12 = smov 0   ;;  %s983_s0 = inlined_call_operand.vmem [shape: bf16[512,8], index: 0, kind: input, shape index: {}]   ;;  %s984_s1 = inlined_call_operand.vmem [shape: bf16[8,8], index: 1, kind: input, shape index: {}]   ;;  %s985_s2 = inlined_call_operand.vmem [shape: f32[1,8], index: 2, kind: input, shape index: {}]   ;;  %s986_s3 = inlined_call_operand.vmem [shape: bf16[512,8], index: 3, kind: output, shape index: {}]  }
   0x1 LB: > { %s614_s13 = sadd.s32 4294967295, %s807_s12   ;;  %p618_p0 = scmp.ge.s32.totalorder %s807_s12, 1  ;;  %s807_s12 = sphi %s829_s12, %s13_s12  }
   0x2   : > { %p138_p1 = scmp.lt.s32.totalorder %s807_s12, 5 }
   0x4   : > { %p139_p2 = pnand %p618_p0, %p138_p1 }
   0x5   : > { %v191_v0 = vld [vmem:[%s984_s1] sm:$0xf] (!%p139_p2)  ;;  %vm264_vm0 = vcmask (!%p139_p2), 1043456   ;;  %s619_s16 = sshll.u32 (!%p139_p2), %s614_s13, 4  ;;  %vm239_vm1 = vcmask (!%p139_p2), 64512   ;;  %vm541_vm2 = vcmask (!%p139_p2), 60416  }
   0x6   : > { %142 = sbr.rel (%p139_p2) target bundleno = 291 (0x123), region = 32  ;;  %719 = vmatprep.subr.msk.bf16.mxu0 (!%p139_p2), %vm264_vm0, %v191_v0  ;;  %720 = vmatprep.subr.msk.bf16.mxu1 (!%p139_p2), %vm264_vm0, %v191_v0  ;;  %v266_v1 = vsel (!%p139_p2), %vm264_vm0, %v191_v0, 0  ;;  %p163_p3 = scmp.lt.s32.totalorder (!%p139_p2), %s619_s16, 63  ;;  %v859_v10 = vld [vmem:[%s985_s2] ss:$0 sm:$0xff] (!%p139_p2) }
   0x7   : > { %700 = vmatpush3.bf16.msra.mxu0 (!%p139_p2), %v266_v1  ;;  %718 = vmatpush3.bf16.msra.mxu1 (!%p139_p2), %v266_v1 }
   0xd   : > { %s988_s16 = smov (!%p163_p3, %s619_s16), 63 }
   0xe   : > { %s620_s17 = sshll.u32 %s988_s16, 2 }
   0xf   : > { %s166_s20 = scalar_lea.vmem %s983_s0, %s620_s17  ;;  %s931_s25 = scalar_lea.vmem %s986_s3, %s620_s17 }
  0x10   : > { %v729_v2 = vld [vmem:[%s166_s20] sm:$0xff]   ;;  %v731_v4 = vld [vmem:[%s166_s20 + $0x8] sm:$0xff]   ;;  %v733_v6 = vld [vmem:[%s166_s20 + $0x10] sm:$0xff]  }
  0x11   : > { %v730_v3 = vld [vmem:[%s166_s20 + $0x20] sm:$0xff]   ;;  %701 = vmatprep.mubr.msk.bf16.mxu0 %vm239_vm1, %v729_v2  ;;  %v732_v5 = vld [vmem:[%s166_s20 + $0x28] sm:$0xff]   ;;  %v734_v7 = vld [vmem:[%s166_s20 + $0x30] sm:$0xff]  }
  0x12   : > { %709 = vmatprep.mubr.msk.bf16.mxu1 %vm239_vm1, %v730_v3  ;;  %702 = vmatmul.mubr.msk.bf16.vlgmr.msra.gmra.mrb[0].mxu0 %vm239_vm1, %v731_v4  ;;  %v735_v8 = vld [vmem:[%s166_s20 + $0x18] sm:$0xff]  }
  0x13   : > { %710 = vmatmul.mubr.msk.bf16.vlgmr.msra.gmra.mrb[0].mxu1 %vm239_vm1, %v732_v5  ;;  %705 = vmatprep.mubr.msk.bf16.mxu0 %vm239_vm1, %v733_v6  ;;  %v736_v9 = vld [vmem:[%s166_s20 + $0x38] sm:$0xff]  }
  0x14   : > { %713 = vmatprep.mubr.msk.bf16.mxu1 %vm239_vm1, %v734_v7 }
  0x1a   : > { %706 = vmatmul.mubr.msk.bf16.gmra.mrb[4].mxu0 %vm239_vm1, %v735_v8 }
  0x1b   : > { %714 = vmatmul.mubr.msk.bf16.gmra.mrb[4].mxu1 %vm239_vm1, %v736_v9 }
  0xe5   : > { %v703_v11 = vpop.f32.mrb[0].mxu0 }
  0xe6   : > { %v862_v12 = vadd.f32 %v703_v11, %v859_v10  ;;  %v711_v13 = vpop.f32.mrb[0].mxu1  ;;  %v302_v14 = vpop.f32.mrb[1].mxu0 }
  0xe7   : > { %v865_v15 = vadd.f32 %v711_v13, %v859_v10  ;;  %v868_v16 = vadd.f32 %v859_v10, %v302_v14  ;;  %v334_v17 = vpop.f32.mrb[1].mxu1  ;;  %v704_v18 = vpop.f32.mrb[2].mxu0 }
  0xe8   : > { %v642_v19 = vmul.f32 -1.442695, %v862_v12  ;;  %v872_v20 = vadd.f32 %v859_v10, %v334_v17  ;;  %v875_v21 = vadd.f32 %v704_v18, %v859_v10  ;;  %v712_v22 = vpop.f32.mrb[2].mxu1  ;;  %v305_v23 = vpop.f32.mrb[3].mxu0 }
  0xe9   : > { %v650_v24 = vmul.f32 -1.442695, %v865_v15  ;;  %v640_v25 = vmul.f32 -1.442695, %v868_v16  ;;  %v880_v26 = vadd.f32 %v712_v22, %v859_v10  ;;  %v883_v27 = vadd.f32 %v859_v10, %v305_v23  ;;  %v337_v28 = vpop.f32.mrb[3].mxu1 }
  0xea   : > { %737 = vpow2.f32 %v642_v19  ;;  %v648_v29 = vmul.f32 -1.442695, %v872_v20  ;;  %v643_v30 = vmul.f32 -1.442695, %v875_v21  ;;  %v888_v31 = vadd.f32 %v859_v10, %v337_v28 }
  0xeb   : > { %739 = vpow2.f32 %v650_v24  ;;  %v651_v32 = vmul.f32 -1.442695, %v880_v26  ;;  %v641_v33 = vmul.f32 -1.442695, %v883_v27 }
  0xec   : > { %741 = vpow2.f32 %v640_v25  ;;  %v649_v34 = vmul.f32 -1.442695, %v888_v31 }
  0xed   : > { %743 = vpow2.f32 %v648_v29  ;;  %v707_v35 = vpop.f32.mrb[4].mxu0 }
  0xee   : > { %745 = vpow2.f32 %v643_v30  ;;  %v894_v36 = vadd.f32 %v707_v35, %v859_v10  ;;  %v715_v37 = vpop.f32.mrb[4].mxu1  ;;  %v318_v38 = vpop.f32.mrb[5].mxu0 }
  0xef   : > { %747 = vpow2.f32 %v651_v32  ;;  %v897_v39 = vadd.f32 %v715_v37, %v859_v10  ;;  %v900_v40 = vadd.f32 %v859_v10, %v318_v38  ;;  %v350_v41 = vpop.f32.mrb[5].mxu1  ;;  %v708_v42 = vpop.f32.mrb[6].mxu0 }
  0xf0   : > { %749 = vpow2.f32 %v641_v33  ;;  %v646_v43 = vmul.f32 -1.442695, %v894_v36  ;;  %v904_v44 = vadd.f32 %v859_v10, %v350_v41  ;;  %v907_v45 = vadd.f32 %v708_v42, %v859_v10  ;;  %v716_v46 = vpop.f32.mrb[6].mxu1  ;;  %v321_v47 = vpop.f32.mrb[7].mxu0 }
  0xf1   : > { %751 = vpow2.f32 %v649_v34  ;;  %v654_v48 = vmul.f32 -1.442695, %v897_v39  ;;  %v644_v49 = vmul.f32 -1.442695, %v900_v40  ;;  %v353_v50 = vpop.f32.mrb[7].mxu1  ;;  %v914_v6 = vadd.f32 %v716_v46, %v859_v10 }
  0xf2   : > { %753 = vpow2.f32 %v646_v43  ;;  %v652_v51 = vmul.f32 -1.442695, %v904_v44  ;;  %v647_v52 = vmul.f32 -1.442695, %v907_v45  ;;  %v917_v9 = vadd.f32 %v859_v10, %v321_v47 }
  0xf3   : > { %755 = vpow2.f32 %v654_v48  ;;  %v920_v14 = vadd.f32 %v859_v10, %v353_v50  ;;  %v655_v23 = vmul.f32 -1.442695, %v914_v6 }
  0xf4   : > { %v738_v53 = vpop.eup %737  ;;  %757 = vpow2.f32 %v644_v49  ;;  %v645_v28 = vmul.f32 -1.442695, %v917_v9 }
  0xf5   : > { %v740_v54 = vpop.eup %739  ;;  %v415_v55 = vadd.f32 1.0, %v738_v53  ;;  %759 = vpow2.f32 %v652_v51  ;;  %v653_v10 = vmul.f32 -1.442695, %v920_v14 }
  0xf6   : > { %v742_v56 = vpop.eup %741  ;;  %v423_v57 = vadd.f32 1.0, %v740_v54  ;;  %761 = vpow2.f32 %v647_v52 }
  0xf7   : > { %v744_v58 = vpop.eup %743  ;;  %763 = vrcp.f32 %v415_v55  ;;  %v413_v59 = vadd.f32 1.0, %v742_v56 }
  0xf8   : > { %v746_v60 = vpop.eup %745  ;;  %765 = vrcp.f32 %v423_v57  ;;  %v421_v61 = vadd.f32 1.0, %v744_v58 }
  0xf9   : > { %v748_v62 = vpop.eup %747  ;;  %767 = vrcp.f32 %v413_v59  ;;  %v416_v63 = vadd.f32 1.0, %v746_v60 }
  0xfa   : > { %v750_v0 = vpop.eup %749  ;;  %769 = vrcp.f32 %v421_v61  ;;  %v424_v1 = vadd.f32 1.0, %v748_v62 }
  0xfb   : > { %v752_v2 = vpop.eup %751  ;;  %771 = vrcp.f32 %v416_v63  ;;  %v414_v3 = vadd.f32 1.0, %v750_v0 }
  0xfc   : > { %v754_v4 = vpop.eup %753  ;;  %773 = vrcp.f32 %v424_v1  ;;  %v422_v5 = vadd.f32 1.0, %v752_v2 }
  0xfd   : > { %v756_v7 = vpop.eup %755  ;;  %775 = vrcp.f32 %v414_v3  ;;  %v419_v8 = vadd.f32 1.0, %v754_v4 }
  0xfe   : > { %v758_v11 = vpop.eup %757  ;;  %777 = vrcp.f32 %v422_v5  ;;  %v427_v13 = vadd.f32 1.0, %v756_v7 }
  0xff   : > { %v760_v17 = vpop.eup %759  ;;  %779 = vrcp.f32 %v419_v8  ;;  %v417_v18 = vadd.f32 1.0, %v758_v11 }
 0x100   : > { %v762_v19 = vpop.eup %761  ;;  %781 = vrcp.f32 %v427_v13  ;;  %v425_v22 = vadd.f32 1.0, %v760_v17 }
 0x101   : > { %v764_v24 = vpop.eup %763  ;;  %783 = vrcp.f32 %v417_v18  ;;  %v420_v25 = vadd.f32 1.0, %v762_v19 }
 0x102   : > { %v766_v29 = vpop.eup %765  ;;  %v463_v30 = vmul.f32 %v764_v24, %v862_v12  ;;  %785 = vrcp.f32 %v425_v22 }
 0x103   : > { %v768_v32 = vpop.eup %767  ;;  %v471_v33 = vmul.f32 %v766_v29, %v865_v15  ;;  %787 = vrcp.f32 %v420_v25 }
 0x104   : > { %v770_v34 = vpop.eup %769  ;;  %v676_v35 = vpack.c.bf16 %v463_v30, %v463_v30  ;;  %v461_v12 = vmul.f32 %v768_v32, %v868_v16  ;;  %789 = vpow2.f32 %v655_v23 }
 0x105   : > { %v772_v37 = vpop.eup %771  ;;  %v684_v38 = vpack.c.bf16 %v471_v33, %v471_v33  ;;  %v469_v41 = vmul.f32 %v770_v34, %v872_v20  ;;  %791 = vpow2.f32 %v645_v28 }
 0x106   : > { %v774_v42 = vpop.eup %773  ;;  %544 = vst.msk [vmem:[%s931_s25 + $0x8] sm:$0xf] %vm541_vm2, %v676_v35  ;;  %v674_v43 = vpack.c.bf16 %v461_v12, %v461_v12  ;;  %v464_v15 = vmul.f32 %v772_v37, %v875_v21  ;;  %793 = vpow2.f32 %v653_v10 }
 0x107   : > { %v776_v46 = vpop.eup %775  ;;  %552 = vst.msk [vmem:[%s931_s25 + $0x28] sm:$0xf] %vm541_vm2, %v684_v38  ;;  %v682_v16 = vpack.c.bf16 %v469_v41, %v469_v41  ;;  %v472_v47 = vmul.f32 %v774_v42, %v880_v26 }
 0x108   : > { %v778_v48 = vpop.eup %777  ;;  %542 = vst.msk [vmem:[%s931_s25] sm:$0xf] %vm541_vm2, %v674_v43  ;;  %v677_v20 = vpack.c.bf16 %v464_v15, %v464_v15  ;;  %v462_v49 = vmul.f32 %v776_v46, %v883_v27 }
 0x109   : > { %v780_v50 = vpop.eup %779  ;;  %550 = vst.msk [vmem:[%s931_s25 + $0x20] sm:$0xf] %vm541_vm2, %v682_v16  ;;  %v685_v21 = vpack.c.bf16 %v472_v47, %v472_v47  ;;  %v470_v51 = vmul.f32 %v778_v48, %v888_v31 }
 0x10a   : > { %v782_v52 = vpop.eup %781  ;;  %545 = vst.msk [vmem:[%s931_s25 + $0xc] sm:$0xf] %vm541_vm2, %v677_v20  ;;  %v675_v53 = vpack.c.bf16 %v462_v49, %v462_v49  ;;  %v467_v26 = vmul.f32 %v780_v50, %v894_v36 }
 0x10b   : > { %v784_v54 = vpop.eup %783  ;;  %553 = vst.msk [vmem:[%s931_s25 + $0x2c] sm:$0xf] %vm541_vm2, %v685_v21  ;;  %v683_v55 = vpack.c.bf16 %v470_v51, %v470_v51  ;;  %v475_v27 = vmul.f32 %v782_v52, %v897_v39 }
 0x10c   : > { %v786_v56 = vpop.eup %785  ;;  %543 = vst.msk [vmem:[%s931_s25 + $0x4] sm:$0xf] %vm541_vm2, %v675_v53  ;;  %v680_v57 = vpack.c.bf16 %v467_v26, %v467_v26  ;;  %v465_v31 = vmul.f32 %v784_v54, %v900_v40 }
 0x10d   : > { %v788_v58 = vpop.eup %787  ;;  %551 = vst.msk [vmem:[%s931_s25 + $0x24] sm:$0xf] %vm541_vm2, %v683_v55  ;;  %v688_v59 = vpack.c.bf16 %v475_v27, %v475_v27  ;;  %v473_v36 = vmul.f32 %v786_v56, %v904_v44 }
 0x10e   : > { %v790_v60 = vpop.eup %789  ;;  %548 = vst.msk [vmem:[%s931_s25 + $0x18] sm:$0xf] %vm541_vm2, %v680_v57  ;;  %v678_v61 = vpack.c.bf16 %v465_v31, %v465_v31  ;;  %v468_v39 = vmul.f32 %v788_v58, %v907_v45 }
 0x10f   : > { %v792_v62 = vpop.eup %791  ;;  %556 = vst.msk [vmem:[%s931_s25 + $0x38] sm:$0xf] %vm541_vm2, %v688_v59  ;;  %v686_v63 = vpack.c.bf16 %v473_v36, %v473_v36  ;;  %v428_v0 = vadd.f32 1.0, %v790_v60 }
 0x110   : > { %v794_v40 = vpop.eup %793  ;;  %546 = vst.msk [vmem:[%s931_s25 + $0x10] sm:$0xf] %vm541_vm2, %v678_v61  ;;  %v681_v1 = vpack.c.bf16 %v468_v39, %v468_v39  ;;  %v418_v2 = vadd.f32 1.0, %v792_v62 }
 0x111   : > { %554 = vst.msk [vmem:[%s931_s25 + $0x30] sm:$0xf] %vm541_vm2, %v686_v63  ;;  %795 = vrcp.f32 %v428_v0  ;;  %v426_v44 = vadd.f32 1.0, %v794_v40 }
 0x112   : > { %549 = vst.msk [vmem:[%s931_s25 + $0x1c] sm:$0xf] %vm541_vm2, %v681_v1  ;;  %797 = vrcp.f32 %v418_v2 }
 0x113   : > { %799 = vrcp.f32 %v426_v44 }
 0x11b   : > { %v796_v45 = vpop.eup %795 }
 0x11c   : > { %v798_v3 = vpop.eup %797  ;;  %v476_v4 = vmul.f32 %v796_v45, %v914_v6 }
 0x11d   : > { %v800_v5 = vpop.eup %799  ;;  %v466_v7 = vmul.f32 %v798_v3, %v917_v9 }
 0x11e   : > { %v689_v8 = vpack.c.bf16 %v476_v4, %v476_v4  ;;  %v474_v11 = vmul.f32 %v800_v5, %v920_v14 }
 0x11f   : > { %v679_v13 = vpack.c.bf16 %v466_v7, %v466_v7 }
 0x120   : > { %557 = vst.msk [vmem:[%s931_s25 + $0x3c] sm:$0xf] %vm541_vm2, %v689_v8  ;;  %v687_v17 = vpack.c.bf16 %v474_v11, %v474_v11 }
 0x121   : > { %547 = vst.msk [vmem:[%s931_s25 + $0x14] sm:$0xf] %vm541_vm2, %v679_v13 }
 0x122   : > { %555 = vst.msk [vmem:[%s931_s25 + $0x34] sm:$0xf] %vm541_vm2, %v687_v17 }
 0x123 PF: > { %s13_s12 = sadd.s32 1, %s807_s12  }
 0x124   : > { %p10_p4 = scmp.ge.s32.totalorder %s13_s12, 6  }
 0x126   :  { %12 = sbr.rel (!%p10_p4) target bundleno = 1 (0x1), region = 62 }

</bundles_post_ra>
